<compile_context>
chip_gen: v6e
topology: v6e:2x2x1
jax: 0.10.0
libtpu: 0.0.40
codegen_flags: <defaults>
</compile_context>

<pallas_src>
import functools

import jax
import jax.numpy as jnp
from jax.experimental import pallas as pl
from jax.experimental.pallas import tpu as pltpu

_LANE = 128
_SUBLANE = 8


def _round_up(x: int, m: int) -> int:
    return (x + m - 1) // m * m


def _vmem_capacity_bytes() -> int:
    """Physical VMEM per TensorCore; conservative (v7x-sized) fallback."""
    try:
        cap = getattr(pltpu.get_tpu_info(), "vmem_capacity_bytes", None)
        if cap:
            return int(cap)
    except Exception:
        pass
    return 64 * 1024 * 1024


def _tile_candidates(dim_padded: int, cap: int):
    """Multiples of 128 dividing dim_padded, <= cap; largest 256-multiples first."""
    cap = max(_LANE, min(dim_padded, cap))
    cands = [t for t in range(_LANE, cap + 1, _LANE) if dim_padded % t == 0]
    if not cands:
        cands = [dim_padded]
    cands.sort(key=lambda t: (t % 256 == 0, t), reverse=True)
    return cands


def _tile_vmem_bytes(tb, tn, tk, in_bytes, out_bytes, multi_k) -> int:
    w = 2 * tk * tn * in_bytes      # double-buffered weight panel
    x = 2 * tb * tk * in_bytes      # double-buffered activations
    o = 2 * tb * tn * out_bytes     # double-buffered output
    b = 2 * tn * 4                  # bias row (f32)
    acc = tb * tn * 4 if multi_k else 0
    return w + x + o + b + acc


# ----------------------------- kernels --------------------------------------


def _mlp_kernel_fused(x_ref, w_ref, b_ref, o_ref):
    # x_ref: [tb, Kp] (bf16)   w_ref: [Kp, tn] (bf16, pre-transposed [K, N])
    # b_ref: [1, tn]  (f32)    o_ref: [tb, tn]
    y = jnp.dot(x_ref[...], w_ref[...], preferred_element_type=jnp.float32)
    o_ref[...] = jnp.tanh(y + b_ref[...]).astype(o_ref.dtype)


def _mlp_kernel_acc(x_ref, w_ref, b_ref, o_ref, acc_ref):
    # Fallback for hidden sizes whose full-K weight panel does not fit VMEM.
    k = pl.program_id(2)

    @pl.when(k == 0)
    def _():
        acc_ref[...] = jnp.zeros_like(acc_ref)

    acc_ref[...] += jnp.dot(
        x_ref[...], w_ref[...], preferred_element_type=jnp.float32
    )

    @pl.when(k == pl.num_programs(2) - 1)
    def _():
        o_ref[...] = jnp.tanh(acc_ref[...] + b_ref[...]).astype(o_ref.dtype)


# ----------------------------- wrappers -------------------------------------


def prepare_mlp_params(weight, bias, compute_dtype=jnp.bfloat16):
    """One-time param prep (hoist out of the per-call path).

    weight: [H_out, H_in] (PyTorch nn.Linear layout); bias: [H_out].
    Returns (w_kn [Kp, Np] compute_dtype, bias_row [1, Np] f32).
    """
    N, K = weight.shape
    assert bias.shape == (N,)
    Kp, Np = _round_up(K, _LANE), _round_up(N, _LANE)
    w_kn = jnp.pad(weight.T, ((0, Kp - K), (0, Np - N))).astype(compute_dtype)
    b_row = jnp.pad(bias.reshape(1, N).astype(jnp.float32), ((0, 0), (0, Np - N)))
    return w_kn, b_row


@functools.partial(jax.jit, static_argnames=("out_features", "compute_dtype"))
def mlp_layer_apply(features, w_kn, b_row, *, out_features,
                    compute_dtype=jnp.bfloat16):
    """tanh(features @ W.T + b) with pre-prepared params. Output dtype follows
    features.dtype; matmul runs in compute_dtype with f32 accumulation."""
    B, K = features.shape
    Kp, Np = w_kn.shape
    assert Kp == _round_up(K, _LANE) and b_row.shape == (1, Np)

    out_dtype = features.dtype
    in_bytes = jnp.dtype(compute_dtype).itemsize
    out_bytes = jnp.dtype(out_dtype).itemsize

    # Batch tiling: single batch tile for small B (CLS head) so W is read once.
    Bp = _round_up(B, _SUBLANE)
    if Bp <= 512:
        tb = Bp
    else:
        tb = 512
        Bp = _round_up(Bp, tb)

    # Generation-aware VMEM budget / limit.
    capacity = _vmem_capacity_bytes()
    budget = capacity // 2
    vmem_limit = int(capacity * 0.75)

    # Keep >=2 out-column programs when possible: megacore (v7x) shards j, so
    # each TC reads a disjoint half of W.
    tn_cap = Np if Np < 2 * _LANE else Np // 2
    tn_cap = min(tn_cap, 2048)

    # Preferred path: collapse reduction (tk = Kp) -> no accumulator, no per-k
    # grid overhead, fused bias+tanh straight into the output store.
    tn = tk = None
    multi_k = False
    for cand_n in _tile_candidates(Np, tn_cap):
        if _tile_vmem_bytes(tb, cand_n, Kp, in_bytes, out_bytes, False) <= budget:
            tn, tk = cand_n, Kp
            break
    if tn is None:
        multi_k = True
        for cand_n in _tile_candidates(Np, tn_cap):
            for cand_k in _tile_candidates(Kp, 2048):
                if _tile_vmem_bytes(tb, cand_n, cand_k, in_bytes, out_bytes,
                                    True) <= budget:
                    tn, tk = cand_n, cand_k
                    break
            if tn is not None:
                break
    if tn is None:  # pathological shapes: smallest lane-aligned tiles
        multi_k = True
        tn, tk = _LANE, _LANE

    # Only the (small) features array is padded / cast per call.
    x = features
    if (Bp, Kp) != (B, K):
        x = jnp.pad(x, ((0, Bp - B), (0, Kp - K)))
    x = x.astype(compute_dtype)

    if multi_k:
        grid = (Bp // tb, Np // tn, Kp // tk)
        kernel = _mlp_kernel_acc
        in_specs = [
            pl.BlockSpec((tb, tk), lambda i, j, k: (i, k)),   # activations
            pl.BlockSpec((tk, tn), lambda i, j, k: (k, j)),   # weight [K, N]
            pl.BlockSpec((1, tn), lambda i, j, k: (0, j)),    # bias row
        ]
        out_specs = pl.BlockSpec((tb, tn), lambda i, j, k: (i, j))
        scratch = [pltpu.VMEM((tb, tn), jnp.float32)]
        semantics = ("arbitrary", "parallel", "arbitrary")
    else:
        grid = (Bp // tb, Np // tn)
        kernel = _mlp_kernel_fused
        in_specs = [
            pl.BlockSpec((tb, tk), lambda i, j: (i, 0)),      # activations
            pl.BlockSpec((tk, tn), lambda i, j: (0, j)),      # weight [K, N]
            pl.BlockSpec((1, tn), lambda i, j: (0, j)),       # bias row
        ]
        out_specs = pl.BlockSpec((tb, tn), lambda i, j: (i, j))
        scratch = []
        semantics = ("arbitrary", "parallel")

    out = pl.pallas_call(
        kernel,
        out_shape=jax.ShapeDtypeStruct((Bp, Np), out_dtype),
        grid_spec=pltpu.PrefetchScalarGridSpec(
            num_scalar_prefetch=0,
            grid=grid,
            in_specs=in_specs,
            out_specs=out_specs,
            scratch_shapes=scratch,
        ),
        compiler_params=pltpu.CompilerParams(
            dimension_semantics=semantics,
            vmem_limit_bytes=vmem_limit,
        ),
    )(x, w_kn, b_row)

    if (Bp, Np) != (B, out_features):
        out = out[:B, :out_features]
    return out


def mlp_layer(features, weight, bias, *, compute_dtype=jnp.bfloat16):
    """Convenience wrapper. For repeated calls with static params, hoist
    prepare_mlp_params(...) out of the loop and call mlp_layer_apply directly."""
    w_kn, b_row = prepare_mlp_params(weight, bias, compute_dtype)
    return mlp_layer_apply(features, w_kn, b_row,
                           out_features=weight.shape[0],
                           compute_dtype=compute_dtype)


if __name__ == "__main__":
    key = jax.random.PRNGKey(0)
    k_x, k_w, k_b = jax.random.split(key, 3)

    B, H = 8, 32  # batch of CLS vectors, hidden_size (toy shapes)
    features = jax.random.normal(k_x, (B, H), dtype=jnp.float32)
    # deterministic "Linear" params (PyTorch layout: [out_features, in_features])
    weight = jax.random.normal(k_w, (H, H), dtype=jnp.float32) * 0.05
    bias = jax.random.normal(k_b, (H,), dtype=jnp.float32) * 0.05

    # One-time param prep (pad/transpose/bf16 cast hoisted out of the per-call
    # path), then the Pallas forward.
    w_kn, b_row = prepare_mlp_params(weight, bias)
    out = mlp_layer_apply(features, w_kn, b_row, out_features=H)
    out = jax.block_until_ready(out)

    # reference check in plain JAX (bf16 MXU operands -> looser tolerance)
    ref = jnp.tanh(features @ weight.T + bias)
    assert out.shape == (B, H)
    assert out.dtype == features.dtype
    assert jnp.allclose(out, ref, atol=2e-2, rtol=2e-2), float(
        jnp.max(jnp.abs(out - ref)))

    print("KERNEL_OK")
</pallas_src>

<mosaic_0001>
module attributes {stable_mosaic.version = 11 : i64} {
  func.func @_mlp_kernel_fused(%arg0: i32, %arg1: i32, %arg2: memref<8x128xbf16, #tpu.memory_space<vmem>>, %arg3: memref<128x128xbf16, #tpu.memory_space<vmem>>, %arg4: memref<1x128xf32, #tpu.memory_space<vmem>>, %arg5: memref<8x128xf32, #tpu.memory_space<vmem>>) attributes {dimension_semantics = [#tpu.dimension_semantics<arbitrary>, #tpu.dimension_semantics<parallel>], iteration_bounds = array<i64: 1, 1>, scalar_prefetch = 0 : i64, scratch_operands = 0 : i64, tpu.core_type = #tpu.core_type<tc>, window_params = [{transform_indices = @transform_0, window_bounds = array<i64: 8, 128>}, {transform_indices = @transform_1, window_bounds = array<i64: 128, 128>}, {transform_indices = @transform_2, window_bounds = array<i64: 1, 128>}, {transform_indices = @transform_3, window_bounds = array<i64: 8, 128>}]} {
    %c0 = arith.constant 0 : index
    %c0_0 = arith.constant 0 : index
    %0 = vector.load %arg2[%c0, %c0_0] : memref<8x128xbf16, #tpu.memory_space<vmem>>, vector<8x128xbf16>
    %c0_1 = arith.constant 0 : index
    %c0_2 = arith.constant 0 : index
    %1 = vector.load %arg3[%c0_1, %c0_2] : memref<128x128xbf16, #tpu.memory_space<vmem>>, vector<128x128xbf16>
    %cst = arith.constant dense<0.000000e+00> : vector<8x128xf32>
    %2 = tpu.matmul %0, %1, %cst {dimension_numbers = #tpu.dot_dimension_numbers<[1], [0], [0], [1], [0, 0, 1, 1], [], []>} : vector<8x128xbf16>, vector<128x128xbf16>, vector<8x128xf32> -> vector<8x128xf32>
    %c0_3 = arith.constant 0 : index
    %c0_4 = arith.constant 0 : index
    %3 = vector.load %arg4[%c0_3, %c0_4] : memref<1x128xf32, #tpu.memory_space<vmem>>, vector<1x128xf32>
    %4 = vector.broadcast %3 : vector<1x128xf32> to vector<8x128xf32>
    %5 = arith.addf %2, %4 : vector<8x128xf32>
    %6 = math.tanh %5 : vector<8x128xf32>
    %c0_5 = arith.constant 0 : index
    %c0_6 = arith.constant 0 : index
    %7 = vector.load %arg5[%c0_5, %c0_6] : memref<8x128xf32, #tpu.memory_space<vmem>>, vector<8x128xf32>
    tpu.vector_store %arg5[%c0_5, %c0_6], %6 {strides = array<i32>} : memref<8x128xf32, #tpu.memory_space<vmem>>, vector<8x128xf32>,
    return
  }
  func.func @transform_0(%arg0: i32, %arg1: i32) -> (i32, i32) {
    %c0_i32 = arith.constant 0 : i32
    %c0_i32_0 = arith.constant 0 : i32
    return %arg0, %c0_i32 : i32, i32
  }
  func.func @transform_1(%arg0: i32, %arg1: i32) -> (i32, i32) {
    %c0_i32 = arith.constant 0 : i32
    %c0_i32_0 = arith.constant 0 : i32
    return %c0_i32, %arg1 : i32, i32
  }
  func.func @transform_2(%arg0: i32, %arg1: i32) -> (i32, i32) {
    %c0_i32 = arith.constant 0 : i32
    %c0_i32_0 = arith.constant 0 : i32
    return %c0_i32, %arg1 : i32, i32
  }
  func.func @transform_3(%arg0: i32, %arg1: i32) -> (i32, i32) {
    %c0_i32 = arith.constant 0 : i32
    return %arg0, %arg1 : i32, i32
  }
}

</mosaic_0001>

<bundles_post_ra>
// kernel: mlp_layer_apply.1
= control target key start
LH: loop header
LB: loop body
LE: loop exit
PB: predicated region body
PF: predicated region fallthrough
CT: control target
= control target key end

     0   :  { %8 = vsyncpa [#allocation3], 0  ;;  %s295_s0 = inlined_call_operand.vmem [shape: bf16[8,128], index: 0, kind: input, shape index: {}]   ;;  %s296_s1 = inlined_call_operand.hbm [shape: bf16[128,128], index: 1, kind: input, shape index: {}]   ;;  %s297_s2 = inlined_call_operand.vmem [shape: f32[1,128], index: 2, kind: input, shape index: {}]   ;;  %s298_s3 = inlined_call_operand.hbm [shape: f32[8,128], index: 3, kind: output, shape index: {}]  }
   0x1   :  { %9 = vsyncpa [#allocation4], 0  ;;  %s257_s12 = smov [#allocation2]  }
   0x2   :  { %s17_s13 = sshll.u32 %s257_s12, 4  ;;  %s18_s13 = int_to_ptr.vmem [resolvable:$true] %s17_s13 }
   0x3   :  { %s221_s14 = scalar_lea.vmem %s18_s13, 1024  ;;  %p226_p1 = scmp.lt.s32.totalorder %s18_s13, %s18_s13 }
   0x4   :  { %p222_p0 = scmp.ne.s32.totalorder %s18_s13, %s221_s14  ;;  %p227_p2 = scmp.lt.s32.totalorder %s221_s14, %s221_s14 }
   0x6   :  { %p228_p3 = por %p227_p2, %p226_p1 }
   0x8   :  { %p229_p4 = pnand %p228_p3, %p222_p0 }
   0xa   :  { %232 = shalt.err (!%p229_p4)
}
   0xb   :  { %s258_s15 = smov 64   ;;  %s259_s16 = smov 4  }
   0xc   :  { %23 = dma.hbm_to_vmem [thread:$0]  %s296_s1, 1024, %s18_s13, [#allocation3], %s258_s15, %s258_s15, %s259_s16  }
   0xd   :  { %253 = dma.done.wait [#allocation3], 1024  }
   0xe   :  { %254 = vsyncadd [#allocation3], 4294966272  ;;  %v260_v0 = vmov 0.0   ;;  %vm261_vm0 = vmmov 0   ;;  %v203_v1 = vld [vmem:[#allocation2 + $0x38] sm:$0xff]   ;;  %v204_v2 = vld [vmem:[#allocation2 + $0x30] sm:$0xff]  }
   0xf   :  { %177 = vmatprep.subr.bf16.mxu0 %v260_v0  ;;  %193 = vmatprep.mubr.msk.bf16.mxu0 %vm261_vm0, %v260_v0  ;;  %v205_v3 = vld [vmem:[#allocation2 + $0x28] sm:$0xff]   ;;  %v206_v4 = vld [vmem:[#allocation2 + $0x20] sm:$0xff]   ;;  %v207_v5 = vld [vmem:[#allocation2 + $0x18] sm:$0xff]   ;;  %s262_s22 = smov [#allocation5]  }
  0x10   :  { %178 = vmatpush3.bf16.msra.mxu0 %v203_v1  ;;  %v208_v6 = vld [vmem:[#allocation2 + $0x10] sm:$0xff]   ;;  %v209_v7 = vld [vmem:[#allocation2 + $0x8] sm:$0xff]   ;;  %v210_v8 = vld [vmem:[#allocation2] sm:$0xff]   ;;  %s150_s23 = sshll.u32 %s262_s22, 4  ;;  %s151_s23 = int_to_ptr.vmem [resolvable:$true] %s150_s23 }
  0x11   :  { %179 = vmatprep.subr.bf16.mxu0 %v260_v0  ;;  %v30_v9 = vld [vmem:[%s295_s0] sm:$0xf]  ;;  %s233_s24 = scalar_lea.vmem %s151_s23, 128  ;;  %p238_p6 = scmp.lt.s32.totalorder %s151_s23, %s151_s23 }
  0x12   :  { %v159_v10 = vld [vmem:[%s297_s2] ss:$0 sm:$0xff]  ;;  %p234_p5 = scmp.ne.s32.totalorder %s151_s23, %s233_s24  ;;  %p239_p7 = scmp.lt.s32.totalorder %s233_s24, %s233_s24 }
  0x14   :  { %180 = vmatpush3.bf16.msra.mxu0 %v204_v2  ;;  %p240_p8 = por %p239_p7, %p238_p6 }
  0x15   :  { %181 = vmatprep.subr.bf16.mxu0 %v260_v0 }
  0x16   :  { %p241_p9 = pnand %p240_p8, %p234_p5 }
  0x18   :  { %182 = vmatpush3.bf16.msra.mxu0 %v205_v3 }
  0x19   :  { %183 = vmatprep.subr.bf16.mxu0 %v260_v0 }
  0x1c   :  { %184 = vmatpush3.bf16.msra.mxu0 %v206_v4 }
  0x1d   :  { %185 = vmatprep.subr.bf16.mxu0 %v260_v0 }
  0x20   :  { %186 = vmatpush3.bf16.msra.mxu0 %v207_v5 }
  0x21   :  { %187 = vmatprep.subr.bf16.mxu0 %v260_v0 }
  0x24   :  { %188 = vmatpush3.bf16.msra.mxu0 %v208_v6 }
  0x25   :  { %189 = vmatprep.subr.bf16.mxu0 %v260_v0 }
  0x28   :  { %190 = vmatpush3.bf16.msra.mxu0 %v209_v7 }
  0x29   :  { %191 = vmatprep.subr.bf16.mxu0 %v260_v0 }
  0x2c   :  { %192 = vmatpush3.bf16.msra.mxu0 %v210_v8 }
  0x2f   :  { %194 = vmatmul.mubr.bf16.vlgmr.msra.gmra.mxu0 %v30_v9 }
  0xef   :  { %v136_v11 = vpop.f32.mrf.mxu0 }
  0xf0   :  { %v137_v12 = vadd.f32 %v159_v10, %v136_v11 }
  0xf1   :  { %v195_v13 = vpop.f32.mrf.mxu0 }
  0xf2   :  { %211 = vtanh.f32 %v137_v12 }
  0xf3   :  { %v139_v14 = vpop.f32.mrf.mxu0 }
  0xf5   :  { %v196_v15 = vpop.f32.mrf.mxu0 }
  0xff   :  { %v212_v16 = vpop.eup %211 }
 0x100   :  { %143 = vst [vmem:[#allocation5] sm:$0xff] %v212_v16 }
 0x101   :  { %244 = shalt.err (!%p241_p9)
}
 0x102   :  { %153 = dma.vmem_to_hbm [thread:$0]  %s151_s23, 128, %s298_s3, [#allocation4]  }
 0x103   :  { %255 = dma.done.wait [#allocation4], 128  }
 0x104   :  { %256 = vsyncadd [#allocation4], 4294967168 }
 0x105   :  { %157 = vsyncpa [#allocation3], 1 }
 0x106   :  { %158 = vsyncpa [#allocation4], 1 }

</bundles_post_ra>
